<compile_context>
chip_gen: v7x
topology: tpu7x:2x2x1
jax: 0.10.0
libtpu: 0.0.40
codegen_flags: <defaults>
</compile_context>

<pallas_src>
import functools

import jax
import jax.numpy as jnp
import numpy as np
from jax.experimental import pallas as pl
from jax.experimental.pallas import tpu as pltpu


_MIB = 1024 * 1024
# Double-buffered operand bytes we allow per grid step (keeps v7x's 64 MiB
# physical VMEM comfortable even with Mosaic internal scratch).
_VMEM_WORKING_SET_BUDGET = 24 * _MIB


def _log_sigmoid(x):
    # numerically stable log(sigmoid(x)) = min(x, 0) - log1p(exp(-|x|))
    return jnp.minimum(x, 0.0) - jnp.log1p(jnp.exp(-jnp.abs(x)))


def _w2v_tile_kernel(h_ref, ctx_ref, loss_ref, *, neg_n):
    """One batch tile.

    h_ref   : (F, Bt)            hidden rows, batch on the 128-lane axis
    ctx_ref : (1+NEG_N, F, Bt)   plane 0 = positive ctx, planes 1.. = negatives
    loss_ref: (1, Bt)            per-element loss (lane-dense output slab)
    """
    h = h_ref[...].astype(jnp.float32)                        # (F, Bt)
    ep = ctx_ref[0].astype(jnp.float32)                       # (F, Bt)

    # Sum negatives BEFORE the dot product (sums commute with the dot; the
    # logsigmoid is applied after the sum over negatives in the reference).
    en_sum = ctx_ref[1].astype(jnp.float32)                   # (F, Bt)
    for j in range(2, neg_n + 1):
        en_sum = en_sum + ctx_ref[j].astype(jnp.float32)

    pos_score = jnp.sum(ep * h, axis=0, keepdims=True)        # (1, Bt) sublane reduce
    neg_score = -jnp.sum(en_sum * h, axis=0, keepdims=True)   # (1, Bt) single negate

    loss_ref[...] = -_log_sigmoid(pos_score) - _log_sigmoid(neg_score)


def _per_element_stream_bytes(n_factors, neg_n, itemsize):
    """Double-buffered VMEM bytes per batch element streamed through the kernel."""
    # hidden (F,) + ctx (1+NEG_N, F) in the operand dtype, plus f32 loss, x2 buffers.
    return 2 * ((1 + (1 + neg_n)) * n_factors * itemsize + 4)


def _pick_tile(B, b_tile, n_factors, neg_n, itemsize):
    if b_tile is not None:
        assert B % b_tile == 0 and b_tile % 128 == 0
        return b_tile
    per_elem = _per_element_stream_bytes(n_factors, neg_n, itemsize)
    cands = [c for c in (32768, 16384, 8192, 4096, 2048, 1024, 512, 256, 128)
             if B % c == 0 and c * per_elem <= _VMEM_WORKING_SET_BUDGET]
    if not cands:
        # TODO(synk): ragged batches need pad+mask (excluding pads from the mean).
        raise ValueError("batch size must be a multiple of 128")
    # Prefer the largest tile that still gives an even grid with >= 4 steps so
    # v7x's two TensorCores each get >= 2 steps (prologue/epilogue overlap).
    for c in cands:
        g = B // c
        if g >= 4 and g % 2 == 0:
            return c
    for c in cands:
        if B // c >= 2:
            return c
    return cands[0]


def _physical_vmem_bytes():
    try:
        return int(pltpu.get_tpu_info().vmem_capacity_bytes)
    except Exception:
        return 64 * _MIB   # v7x per-TensorCore VMEM — most conservative


def word2vec_loss(w1, w2, target, pos, neg, *, b_tile=None,
                  operand_dtype=jnp.bfloat16):
    """Pallas implementation of Wrod2vec.forward (negatives passed explicitly).

    operand_dtype: dtype of the gathered operands fed to the kernel
      (accumulation / logsigmoid remain f32 in-kernel).  bfloat16 halves HBM
      traffic on this bandwidth-bound problem; pass jnp.float32 (or None to
      inherit w1.dtype) for bit-tighter numerics.
    """
    n_aids, n_factors = w1.shape
    target = target.reshape(-1).astype(jnp.int32)
    pos = pos.reshape(-1).astype(jnp.int32)
    neg = neg.astype(jnp.int32)
    B = target.shape[0]
    neg_n = neg.shape[1]

    op_dtype = w1.dtype if operand_dtype is None else jnp.dtype(operand_dtype)
    itemsize = jnp.dtype(op_dtype).itemsize

    bt = _pick_tile(B, b_tile, n_factors, neg_n, itemsize)
    grid = (B // bt,)

    working_set = bt * _per_element_stream_bytes(n_factors, neg_n, itemsize)
    vmem_limit = min(max(2 * working_set, 8 * _MIB), _physical_vmem_bytes() // 2)

    # --- Operand prep (XLA side): coalesced gathers, batch on the lane axis ---
    # One merged (B, 1+NEG_N) index array -> a single gather + transpose
    # producer and a single pipelined context input stream.
    comb = jnp.concatenate([pos[:, None], neg], axis=1)                  # (B, 1+N)
    hidden = jnp.take(w1, target, axis=0).astype(op_dtype).T             # (F, B)
    ctx = jnp.take(w2, comb.reshape(-1), axis=0).astype(op_dtype)
    ctx = jnp.transpose(ctx.reshape(B, 1 + neg_n, n_factors), (1, 2, 0))  # (1+N, F, B)
    # TODO(synk): if profiling shows the gather+transpose still materializes in
    # HBM despite allow_input_fusion, switch to a row-major (B//4, 128)-packed
    # layout with in-kernel segmented roll reductions to drop the transpose pass.

    cp_kwargs = dict(dimension_semantics=("parallel",),   # no cross-tile dependence
                     vmem_limit_bytes=int(vmem_limit))
    try:
        compiler_params = pltpu.CompilerParams(
            allow_input_fusion=[True, True], **cp_kwargs)
    except TypeError:   # older jax without the field
        compiler_params = pltpu.CompilerParams(**cp_kwargs)

    losses = pl.pallas_call(
        functools.partial(_w2v_tile_kernel, neg_n=neg_n),
        out_shape=jax.ShapeDtypeStruct((1, B), jnp.float32),
        grid_spec=pltpu.PrefetchScalarGridSpec(
            num_scalar_prefetch=0,
            grid=grid,
            in_specs=[
                pl.BlockSpec((n_factors, bt), lambda i: (0, i)),
                pl.BlockSpec((1 + neg_n, n_factors, bt), lambda i: (0, 0, i)),
            ],
            out_specs=pl.BlockSpec((1, bt), lambda i: (0, i)),
        ),
        compiler_params=compiler_params,
    )(hidden, ctx)

    return jnp.mean(losses)


def word2vec_loss_ref(w1, w2, target, pos, neg):
    """Pure-JAX f32 reference matching the PyTorch forward."""
    B = target.reshape(-1).shape[0]
    hidden = w1[target.reshape(B)]                                  # (B, F)
    ep = w2[pos.reshape(B)]                                         # (B, F)
    en = w2[neg]                                                    # (B, NEG_N, F)
    pos_score = jnp.sum(ep * hidden, axis=-1)                       # (B,)
    neg_score = jnp.sum(en * (-hidden)[:, None, :], axis=(1, 2))    # (B,)
    return jnp.mean(-_log_sigmoid(pos_score) - _log_sigmoid(neg_score))


if __name__ == "__main__":
    key = jax.random.PRNGKey(0)
    # Small synthetic stand-ins for (n_aids=1855602, BATCH_SIZE=65536, NEG_N=2).
    n_aids, n_factors = 2048, 32
    B, NEG_N = 512, 2

    k1, k2, k3, k4, k5 = jax.random.split(key, 5)
    w1 = jax.random.normal(k1, (n_aids, n_factors), jnp.float32) * 0.1
    w2 = jax.random.normal(k2, (n_aids, n_factors), jnp.float32) * 0.1
    target = jax.random.randint(k3, (B, 1), 0, n_aids, dtype=jnp.int32)
    pos = jax.random.randint(k4, (B, 1), 0, n_aids, dtype=jnp.int32)
    # TODO(synk): the module draws negatives with torch.randint inside forward;
    # here they are drawn deterministically host-side with jax.random instead.
    neg = jax.random.randint(k5, (B, NEG_N), 0, n_aids, dtype=jnp.int32)

    ref = jax.block_until_ready(word2vec_loss_ref(w1, w2, target, pos, neg))

    # f32 operand path: bit-tight check (auto tile picker -> grid of 4 at B=512).
    loss_f32 = jax.block_until_ready(
        word2vec_loss(w1, w2, target, pos, neg, operand_dtype=jnp.float32))
    np.testing.assert_allclose(np.asarray(loss_f32), np.asarray(ref),
                               rtol=1e-5, atol=1e-5)

    # Default bf16-operand path (perf config): looser tolerance, f32 accumulate.
    loss_bf16 = jax.block_until_ready(word2vec_loss(w1, w2, target, pos, neg))
    np.testing.assert_allclose(np.asarray(loss_bf16), np.asarray(ref),
                               rtol=3e-3, atol=3e-3)

    print("KERNEL_OK")
</pallas_src>

<mosaic_0001>
module attributes {stable_mosaic.version = 11 : i64} {
  func.func @_w2v_tile_kernel(%arg0: i32, %arg1: memref<32x128xf32, #tpu.memory_space<vmem>>, %arg2: memref<3x32x128xf32, #tpu.memory_space<vmem>>, %arg3: memref<1x128xf32, #tpu.memory_space<vmem>>) attributes {dimension_semantics = [#tpu.dimension_semantics<parallel>], iteration_bounds = array<i64: 4>, scalar_prefetch = 0 : i64, scratch_operands = 0 : i64, tpu.core_type = #tpu.core_type<tc>, window_params = [{transform_indices = @transform_0, window_bounds = array<i64: 32, 128>}, {transform_indices = @transform_1, window_bounds = array<i64: 3, 32, 128>}, {transform_indices = @transform_2, window_bounds = array<i64: 1, 128>}]} {
    %c0 = arith.constant 0 : index
    %c0_0 = arith.constant 0 : index
    %0 = vector.load %arg1[%c0, %c0_0] : memref<32x128xf32, #tpu.memory_space<vmem>>, vector<32x128xf32>
    %c0_1 = arith.constant 0 : index
    %c0_2 = arith.constant 0 : index
    %c0_3 = arith.constant 0 : index
    %1 = vector.load %arg2[%c0_1, %c0_2, %c0_3] : memref<3x32x128xf32, #tpu.memory_space<vmem>>, vector<1x32x128xf32>
    %2 = vector.shape_cast %1 : vector<1x32x128xf32> to vector<32x128xf32>
    %c1 = arith.constant 1 : index
    %c0_4 = arith.constant 0 : index
    %c0_5 = arith.constant 0 : index
    %3 = vector.load %arg2[%c1, %c0_4, %c0_5] : memref<3x32x128xf32, #tpu.memory_space<vmem>>, vector<1x32x128xf32>
    %4 = vector.shape_cast %3 : vector<1x32x128xf32> to vector<32x128xf32>
    %c2 = arith.constant 2 : index
    %c0_6 = arith.constant 0 : index
    %c0_7 = arith.constant 0 : index
    %5 = vector.load %arg2[%c2, %c0_6, %c0_7] : memref<3x32x128xf32, #tpu.memory_space<vmem>>, vector<1x32x128xf32>
    %6 = vector.shape_cast %5 : vector<1x32x128xf32> to vector<32x128xf32>
    %7 = arith.addf %4, %6 : vector<32x128xf32>
    %8 = arith.mulf %2, %0 : vector<32x128xf32>
    %cst = arith.constant dense<0.000000e+00> : vector<128xf32>
    %9 = vector.multi_reduction <add>, %8, %cst [0] : vector<32x128xf32> to vector<128xf32>
    %10 = vector.shape_cast %9 : vector<128xf32> to vector<1x128xf32>
    %11 = arith.mulf %7, %0 : vector<32x128xf32>
    %cst_8 = arith.constant dense<0.000000e+00> : vector<128xf32>
    %12 = vector.multi_reduction <add>, %11, %cst_8 [0] : vector<32x128xf32> to vector<128xf32>
    %13 = vector.shape_cast %12 : vector<128xf32> to vector<1x128xf32>
    %cst_9 = arith.constant 0.000000e+00 : f32
    %14 = vector.broadcast %cst_9 : f32 to vector<1x128xf32>
    %15 = arith.subf %14, %13 : vector<1x128xf32>
    %cst_10 = arith.constant 0.000000e+00 : f32
    %16 = vector.broadcast %cst_10 : f32 to vector<1x128xf32>
    %17 = arith.minimumf %10, %16 : vector<1x128xf32>
    %18 = math.absf %10 : vector<1x128xf32>
    %cst_11 = arith.constant 0.000000e+00 : f32
    %19 = vector.broadcast %cst_11 : f32 to vector<1x128xf32>
    %20 = arith.subf %19, %18 : vector<1x128xf32>
    %21 = math.exp %20 : vector<1x128xf32>
    %22 = math.log1p %21 : vector<1x128xf32>
    %23 = arith.subf %17, %22 : vector<1x128xf32>
    %cst_12 = arith.constant 0.000000e+00 : f32
    %24 = vector.broadcast %cst_12 : f32 to vector<1x128xf32>
    %25 = arith.subf %24, %23 : vector<1x128xf32>
    %cst_13 = arith.constant 0.000000e+00 : f32
    %26 = vector.broadcast %cst_13 : f32 to vector<1x128xf32>
    %27 = arith.minimumf %15, %26 : vector<1x128xf32>
    %28 = math.absf %15 : vector<1x128xf32>
    %cst_14 = arith.constant 0.000000e+00 : f32
    %29 = vector.broadcast %cst_14 : f32 to vector<1x128xf32>
    %30 = arith.subf %29, %28 : vector<1x128xf32>
    %31 = math.exp %30 : vector<1x128xf32>
    %32 = math.log1p %31 : vector<1x128xf32>
    %33 = arith.subf %27, %32 : vector<1x128xf32>
    %34 = arith.subf %25, %33 : vector<1x128xf32>
    %c0_15 = arith.constant 0 : index
    %c0_16 = arith.constant 0 : index
    %35 = vector.load %arg3[%c0_15, %c0_16] : memref<1x128xf32, #tpu.memory_space<vmem>>, vector<1x128xf32>
    tpu.vector_store %arg3[%c0_15, %c0_16], %34 {strides = array<i32>} : memref<1x128xf32, #tpu.memory_space<vmem>>, vector<1x128xf32>,
    return
  }
  func.func @transform_0(%arg0: i32) -> (i32, i32) {
    %c0_i32 = arith.constant 0 : i32
    %c0_i32_0 = arith.constant 0 : i32
    return %c0_i32, %arg0 : i32, i32
  }
  func.func @transform_1(%arg0: i32) -> (i32, i32, i32) {
    %c0_i32 = arith.constant 0 : i32
    %c0_i32_0 = arith.constant 0 : i32
    %c0_i32_1 = arith.constant 0 : i32
    return %c0_i32, %c0_i32_0, %arg0 : i32, i32, i32
  }
  func.func @transform_2(%arg0: i32) -> (i32, i32) {
    %c0_i32 = arith.constant 0 : i32
    %c0_i32_0 = arith.constant 0 : i32
    return %c0_i32, %arg0 : i32, i32
  }
}

</mosaic_0001>

<bundles_post_ra>
// kernel: tpu_custom_call.1
= control target key start
LH: loop header
LB: loop body
LE: loop exit
PB: predicated region body
PF: predicated region fallthrough
CT: control target
= control target key end

     0   :  { %7 = vsyncpa [#allocation3], 0  ;;  %s839_s0 = inlined_call_operand.hbm [shape: f32[32,512], index: 0, kind: input, shape index: {}]   ;;  %s840_s1 = inlined_call_operand.hbm [shape: f32[3,32,512], index: 1, kind: input, shape index: {}]   ;;  %s841_s2 = inlined_call_operand.hbm [shape: f32[1,512], index: 2, kind: output, shape index: {}]  }
   0x1   :  { %9 = vsyncpa [#allocation3 + $0x1], 0 }
   0x2   :  { %10 = vsyncpa [#allocation6], 0 }
   0x3   :  { %12 = vsyncpa [#allocation6 + $0x1], 0 }
   0x4   :  { %13 = vsyncpa [#allocation4], 0 }
   0x5   :  { %15 = vsyncpa [#allocation4 + $0x1], 0  ;;  %s619_s9 = smov 0   ;;  %s621_s10 = smov 0  }
   0x6   :  { %s623_s11 = smov 0   ;;  %s625_s12 = smov 0  }
   0x7 LB: > { %s640_s13 = sadd.s32 4294967295, %s596_s12   ;;  %s383_s14 = sadd.s32 4294967294, %s596_s12   ;;  %s596_s12 = sphi %s625_s12, %s857_s12   ;;  %s592_s11 = sphi %s623_s11, %s856_s11   ;;  %s588_s10 = sphi %s621_s10, %s855_s10   ;;  %s584_s9 = sphi %s619_s9, %s854_s9  }
   0x8   : > { %s644_s15 = sadd.s32 1, %s596_s12   ;;  %s28_s16 = sadd.s32 1, %s592_s11 }
   0x9   : > { %s25_s17 = ssub.s32 %s596_s12, %s644_s15  ;;  %p35_p0 = scmp.ne.s32.totalorder %s592_s11, %s588_s10 }
   0xa   : > { %p26_p1 = scmp.eq.s32.totalorder %s25_s17, 0  ;;  %p36_p2 = scmp.eq.s32.totalorder %s596_s12, 0 }
   0xb   : > { %p41_p3 = scmp.ne.s32.totalorder %s588_s10, %s584_s9  ;;  %p42_p4 = scmp.eq.s32.totalorder %s640_s13, 0 }
   0xc   : > { %s656_s18 = scalar_select %p26_p1, %s592_s11, %s28_s16  }
   0xd   : > { %p658_p5 = por %p36_p2, %p35_p0  ;;  %p662_p6 = por %p42_p4, %p41_p3 }
   0xe   : > { %p91_p7 = scmp.eq.s32.totalorder %s640_s13, 3  ;;  %p97_p8 = scmp.eq.s32.totalorder %s383_s14, 3 }
   0xf   : > { %s845_s20 = scalar_select %p662_p6, 1, 0 }
  0x10   : > { %p421_p9 = scmp.lt.s32.totalorder %s596_s12, 4  ;;  %p668_p10 = por %p91_p7, %p35_p0 }
  0x11   : > { %p672_p11 = por %p97_p8, %p41_p3  ;;  %s677_s23 = sand.u32 1, %s592_s11  }
  0x12   : > { %s846_s21 = scalar_select %p668_p10, 1, 0 }
  0x13   : > { %s847_s22 = scalar_select %p672_p11, 1, 0 }
  0x14   : > { %s387_s24 = sshll.u32 %s596_s12, 7  ;;  %s386_s25 = sshll.u32 %s677_s23, 5 }
  0x15   : > { %s686_s28 = scalar_lea.hbm %s839_s0, %s387_s24  ;;  %s121_s29 = scalar_lea.vmem [#allocation2], %s386_s25 }
  0x16   : > { %s127_s30 = sshll.u32 %s121_s29, 4  ;;  %p690_p12 = pnand %p421_p9, %p658_p5  ;;  %s694_s30 = int_to_ptr.vmem [resolvable:$true] %s127_s30 }
  0x17   : > { %s118_s4 = scalar_lea.sflag [#allocation3], %s677_s23  ;;  %s466_s5 = scalar_lea.hbm %s686_s28, 512 }
  0x18   : > { %p467_p0 = scmp.ne.s32.totalorder %s686_s28, %s466_s5  ;;  %p468_p1 = pneg %p690_p12 }
  0x19   : > { %s471_s8 = scalar_lea.hbm %s839_s0, 2048  ;;  %p472_p4 = scmp.lt.u32.totalorder %s686_s28, %s839_s0 }
  0x1a   : > { %p469_p2 = pnand %p468_p1, %p467_p0  ;;  %p473_p5 = scmp.lt.u32.totalorder %s471_s8, %s466_s5 }
  0x1b   : > { %p475_p8 = scmp.lt.u32.totalorder %s466_s5, %s686_s28 }
  0x1c   : > { %p470_p3 = pneg %p469_p2  ;;  %p474_p7 = por %p473_p5, %p472_p4 }
  0x1e   : > { %p476_p9 = por %p475_p8, %p474_p7 }
  0x20   : > { %p477_p13 = pnand %p476_p9, %p470_p3 }
  0x22   : > { %480 = shalt.err (!%p477_p13)
}
  0x23   : > { %s481_s17 = scalar_lea.vmem %s694_s30, 512  ;;  %s598_s19 = smov [#allocation2]  }
  0x24   : > { %p482_p0 = scmp.ne.s32.totalorder %s694_s30, %s481_s17  ;;  %s486_s25 = sshll.u32 %s598_s19, 4  ;;  %s487_s25 = int_to_ptr.vmem [resolvable:$false] %s486_s25 }
  0x25   : > { %s488_s26 = scalar_lea.vmem %s487_s25, 1024  ;;  %p489_p10 = scmp.lt.s32.totalorder %s694_s30, %s487_s25 }
  0x26   : > { %p484_p2 = pnand %p482_p0, %p468_p1  ;;  %p490_p4 = scmp.lt.s32.totalorder %s488_s26, %s481_s17 }
  0x28   : > { %p485_p11 = pneg %p484_p2  ;;  %p491_p5 = por %p490_p4, %p489_p10 }
  0x2a   : > { %p492_p7 = pnand %p491_p5, %p485_p11 }
  0x2c   : > { %495 = shalt.err (!%p492_p7)
}
  0x2d   : > { %s599_s27 = smov 512   ;;  %s600_s29 = smov 128  }
  0x2e   : > { %s601_s5 = smov 8   ;;  %p155_p10 = scmp.lt.s32.totalorder %s596_s12, 5 }
  0x2f   : > { %413 = dma.hbm_to_vmem [thread:$0]  (!%p690_p12), %s686_s28, 512, %s694_s30, %s118_s4, %s599_s27, %s600_s29, %s601_s5  }
  0x30   : > { %s402_s6 = smul.u32 96, %s677_s23  ;;  %p849_p11 = scmp.ge.s32.totalorder %s596_s12, 1 }
  0x31   : > { %s741_s16 = scalar_lea.hbm %s840_s1, %s387_s24  ;;  %s138_s28 = scalar_lea.sflag [#allocation6], %s677_s23 }
  0x32   : > { %p732_p13 = pnand %p849_p11, %p155_p10  ;;  %s141_s17 = scalar_lea.vmem [#allocation5], %s402_s6 }
  0x33   : > { %s147_s19 = sshll.u32 %s141_s17, 4  ;;  %s496_s30 = scalar_lea.hbm %s741_s16, 1536  ;;  %s743_s19 = int_to_ptr.vmem [resolvable:$true] %s147_s19 }
  0x34   : > { %p497_p3 = scmp.ne.s32.totalorder %s741_s16, %s496_s30  ;;  %s501_s24 = scalar_lea.hbm %s840_s1, 6144 }
  0x35   : > { %p502_p0 = scmp.lt.u32.totalorder %s741_s16, %s840_s1  ;;  %p503_p2 = scmp.lt.u32.totalorder %s501_s24, %s496_s30 }
  0x36   : > { %p499_p8 = pnand %p497_p3, %p468_p1  ;;  %p505_p5 = scmp.lt.u32.totalorder %s496_s30, %s741_s16 }
  0x37   : > { %p504_p4 = por %p503_p2, %p502_p0 }
  0x38   : > { %p500_p9 = pneg %p499_p8 }
  0x39   : > { %p506_p7 = por %p505_p5, %p504_p4 }
  0x3b   : > { %p507_p10 = pnand %p506_p7, %p500_p9 }
  0x3d   : > { %510 = shalt.err (!%p507_p10)
}
  0x3e   : > { %s511_s6 = scalar_lea.vmem %s743_s19, 1536  ;;  %s602_s14 = smov [#allocation5]  }
  0x3f   : > { %p512_p11 = scmp.ne.s32.totalorder %s743_s19, %s511_s6  ;;  %s516_s17 = sshll.u32 %s602_s14, 4  ;;  %s517_s17 = int_to_ptr.vmem [resolvable:$false] %s516_s17 }
  0x40   : > { %s518_s4 = scalar_lea.vmem %s517_s17, 3072  ;;  %p519_p6 = scmp.lt.s32.totalorder %s743_s19, %s517_s17 }
  0x41   : > { %p514_p3 = pnand %p512_p11, %p468_p1  ;;  %p520_p0 = scmp.lt.s32.totalorder %s518_s4, %s511_s6 }
  0x43   : > { %p515_p8 = pneg %p514_p3  ;;  %p521_p2 = por %p520_p0, %p519_p6 }
  0x45   : > { %p522_p4 = pnand %p521_p2, %p515_p8 }
  0x47   : > { %525 = shalt.err (!%p522_p4)
}
  0x48   : > { %416 = dma.hbm_to_vmem [thread:$0]  (!%p690_p12), %s741_s16, 1536, %s743_s19, %s138_s28, %s599_s27, %s600_s29, %s601_s5  }
  0x49   : > { %159 = sbr.rel (%p732_p13) target bundleno = 165 (0xa5), region = 28  ;;  %s777_s30 = sand.u32 (!%p732_p13), 1, %s588_s10  }
  0x4a   : > { %s390_s25 = sshll.u32 (!%p732_p13), %s777_s30, 5  ;;  %s162_s24 = scalar_lea.sflag (!%p732_p13), [#allocation3], %s777_s30 }
  0x4b   : > { %s165_s3 = scalar_lea.vmem (!%p732_p13), [#allocation2], %s390_s25  ;;  %p851_p6 = scmp.ne.s32.totalorder (!%p732_p13), %s845_s20, 0 }
  0x50   : > { %571 = dma.done.wait (%p851_p6), %s162_s24, 512  }
  0x51   : > { %573 = vsyncadd (%p851_p6), %s162_s24, 4294966784  ;;  %s403_s23 = smul.u32 96, %s777_s30  ;;  %s171_s27 = scalar_lea.sflag [#allocation6], %s777_s30 }
  0x53   : > { %s174_s29 = scalar_lea.vmem [#allocation5], %s403_s23 }
  0x54   : > { %575 = dma.done.wait (%p851_p6), %s171_s27, 1536  }
  0x55   : > { %577 = vsyncadd (%p851_p6), %s171_s27, 4294965760  ;;  %v199_v0 = vld [vmem:[%s165_s3] sm:$0xff]  ;;  %v200_v1 = vld [vmem:[%s165_s3 + $0x8] sm:$0xff]  ;;  %s198_s20 = scalar_lea.vmem [#allocation7], %s777_s30  ;;  %s399_s7 = sshll.u32 %s640_s13, 4 }
  0x56   : > { %v201_v2 = vld [vmem:[%s165_s3 + $0x10] sm:$0xff]  ;;  %v202_v3 = vld [vmem:[%s165_s3 + $0x18] sm:$0xff]  ;;  %v203_v4 = vld [vmem:[%s174_s29] sm:$0xff]  ;;  %s294_s5 = sshll.u32 %s198_s20, 4  ;;  %s798_s28 = scalar_lea.hbm %s841_s2, %s399_s7  ;;  %s793_s5 = int_to_ptr.vmem [resolvable:$true] %s294_s5 }
  0x57   : > { %v204_v5 = vld [vmem:[%s174_s29 + $0x8] sm:$0xff]  ;;  %v205_v6 = vld [vmem:[%s174_s29 + $0x10] sm:$0xff]  ;;  %v206_v7 = vld [vmem:[%s174_s29 + $0x18] sm:$0xff]  ;;  %v221_v9 = vmul.f32 %v203_v4, %v199_v0  ;;  %s282_s26 = scalar_lea.sflag [#allocation4], %s777_s30  ;;  %s526_s8 = scalar_lea.vmem %s793_s5, 16 }
  0x58   : > { %v391_v8 = vld [vmem:[%s174_s29 + $0x20] sm:$0xff]  ;;  %v222_v10 = vmul.f32 %v204_v5, %v200_v1  ;;  %v392_v11 = vld [vmem:[%s174_s29 + $0x28] sm:$0xff]  ;;  %v393_v12 = vld [vmem:[%s174_s29 + $0x30] sm:$0xff]  ;;  %v223_v14 = vmul.f32 %v205_v6, %v201_v2  ;;  %v224_v18 = vmul.f32 %v206_v7, %v202_v3  ;;  %p527_p12 = scmp.ne.s32.totalorder %s793_s5, %s526_s8  ;;  %p852_p1 = scmp.ne.s32.totalorder %s846_s21, 0 }
  0x59   : > { %v394_v13 = vld [vmem:[%s174_s29 + $0x38] sm:$0xff]  ;;  %v395_v15 = vld [vmem:[%s174_s29 + $0x40] sm:$0xff]  ;;  %v396_v16 = vld [vmem:[%s174_s29 + $0x48] sm:$0xff]  ;;  %s603_s13 = smov [#allocation7]  }
  0x5a   : > { %v397_v17 = vld [vmem:[%s174_s29 + $0x50] sm:$0xff]  ;;  %v225_v19 = vadd.f32 %v222_v10, %v221_v9  ;;  %v398_v20 = vld [vmem:[%s174_s29 + $0x58] sm:$0xff]  ;;  %v217_v21 = vadd.f32 %v395_v15, %v391_v8  ;;  %v218_v22 = vadd.f32 %v396_v16, %v392_v11  ;;  %p528_p13 = pnand %p527_p12, %p852_p1  ;;  %s530_s6 = sshll.u32 %s603_s13, 4  ;;  %s531_s6 = int_to_ptr.vmem [resolvable:$false] %s530_s6 }
  0x5b   : > { %v219_v23 = vadd.f32 %v397_v17, %v393_v12  ;;  %v220_v24 = vadd.f32 %v398_v20, %v394_v13  ;;  %s532_s14 = scalar_lea.vmem %s531_s6, 32  ;;  %p533_p5 = scmp.lt.s32.totalorder %s793_s5, %s531_s6 }
  0x5c   : > { %v226_v25 = vadd.f32 %v225_v19, %v223_v14  ;;  %v234_v26 = vmul.f32 %v217_v21, %v199_v0  ;;  %v235_v27 = vmul.f32 %v218_v22, %v200_v1  ;;  %p529_p9 = pneg %p528_p13  ;;  %p534_p7 = scmp.lt.s32.totalorder %s532_s14, %s526_s8 }
  0x5d   : > { %v236_v28 = vmul.f32 %v219_v23, %v201_v2  ;;  %v237_v30 = vmul.f32 %v220_v24, %v202_v3 }
  0x5e   : > { %v227_v29 = vadd.f32 %v226_v25, %v224_v18  ;;  %v238_v31 = vadd.f32 %v235_v27, %v234_v26  ;;  %p535_p10 = por %p534_p7, %p533_p5 }
  0x60   : > { %v228_v32 = vrot.slane %v227_v29, 4  ;;  %v239_v33 = vadd.f32 %v238_v31, %v236_v28  ;;  %p536_p11 = pnand %p535_p10, %p529_p9 }
  0x62   : > { %v229_v34 = vadd.f32 %v228_v32, %v227_v29  ;;  %v240_v35 = vadd.f32 %v239_v33, %v237_v30 }
  0x64   : > { %v230_v36 = vrot.slane %v229_v34, 2  ;;  %v241_v37 = vrot.slane %v240_v35, 4 }
  0x66   : > { %v231_v38 = vadd.f32 %v230_v36, %v229_v34  ;;  %v242_v39 = vadd.f32 %v241_v37, %v240_v35 }
  0x68   : > { %v232_v40 = vrot.slane %v231_v38, 1  ;;  %v243_v41 = vrot.slane %v242_v39, 2 }
  0x6a   : > { %v233_v42 = vadd.f32 %v232_v40, %v231_v38  ;;  %v244_v43 = vadd.f32 %v243_v41, %v242_v39 }
  0x6c   : > { %v249_v44 = vand.u32 2147483647, %v233_v42  ;;  %v245_v45 = vrot.slane %v244_v43, 1  ;;  %v248_v63 = vmin.f32 %v233_v42, 0.0 }
  0x6e   : > { %v250_v46 = vsub.f32 0.0, %v249_v44  ;;  %v246_v47 = vadd.f32 %v245_v45, %v244_v43 }
  0x70   : > { %v251_v48 = vmul.f32 1.442695, %v250_v46  ;;  %v247_v49 = vsub.f32 0.0, %v246_v47 }
  0x72   : > { %458 = vpow2.f32 %v251_v48  ;;  %v265_v50 = vand.u32 2147483647, %v247_v49  ;;  %v264_v7 = vmin.f32 %v247_v49, 0.0 }
  0x74   : > { %v266_v51 = vsub.f32 0.0, %v265_v50 }
  0x76   : > { %v267_v52 = vmul.f32 1.442695, %v266_v51 }
  0x78   : > { %460 = vpow2.f32 %v267_v52 }
  0x7c   : > { %v459_v53 = vpop.eup %458 }
  0x7d   : > { %v253_v54 = vadd.f32 1.0, %v459_v53  ;;  %v256_v55 = vmul.f32 -0.5, %v459_v53  ;;  %v259_v59 = vand.u32 2147483647, %v459_v53 }
  0x7f   : > { %462 = vlog2.f32 %v253_v54  ;;  %v257_v57 = vadd.f32 1.0, %v256_v55  ;;  %vm260_vm0 = vcmp.lt.f32.partialorder %v259_v59, 0.0004427343 }
  0x81   : > { %v258_v61 = vmul.f32 %v459_v53, %v257_v57 }
  0x82   : > { %v461_v56 = vpop.eup %460 }
  0x83   : > { %v269_v58 = vadd.f32 1.0, %v461_v56  ;;  %v272_v60 = vmul.f32 -0.5, %v461_v56  ;;  %v275_v3 = vand.u32 2147483647, %v461_v56 }
  0x85   : > { %464 = vlog2.f32 %v269_v58  ;;  %v273_v1 = vadd.f32 1.0, %v272_v60  ;;  %vm276_vm1 = vcmp.lt.f32.partialorder %v275_v3, 0.0004427343 }
  0x87   : > { %v274_v5 = vmul.f32 %v461_v56, %v273_v1 }
  0x89   : > { %v463_v62 = vpop.eup %462 }
  0x8a   : > { %v255_v0 = vmul.f32 0.6931472, %v463_v62 }
  0x8c   : > { %v261_v2 = vsel %vm260_vm0, %v258_v61, %v255_v0 }
  0x8d   : > { %v262_v4 = vsub.f32 %v248_v63, %v261_v2 }
  0x8f   : > { %v465_v6 = vpop.eup %464  ;;  %v263_v9 = vsub.f32 0.0, %v262_v4 }
  0x90   : > { %v271_v8 = vmul.f32 0.6931472, %v465_v6 }
  0x92   : > { %v277_v10 = vsel %vm276_vm1, %v274_v5, %v271_v8 }
  0x93   : > { %v278_v11 = vsub.f32 %v264_v7, %v277_v10 }
  0x95   : > { %v279_v12 = vsub.f32 %v263_v9, %v278_v11 }
  0x97   : > { %280 = vst [vmem:[%s198_s20] sm:$0x1] %v279_v12 }
  0x98   : > { %539 = shalt.err (!%p536_p11)
}
  0x99   : > { %s540_s17 = scalar_lea.hbm %s798_s28, 16  ;;  %s544_s25 = scalar_lea.hbm %s841_s2, 64 }
  0x9a   : > { %p541_p3 = scmp.ne.s32.totalorder %s798_s28, %s540_s17  ;;  %p545_p2 = scmp.lt.u32.totalorder %s798_s28, %s841_s2 }
  0x9b   : > { %p546_p4 = scmp.lt.u32.totalorder %s544_s25, %s540_s17  ;;  %p548_p12 = scmp.lt.u32.totalorder %s540_s17, %s798_s28 }
  0x9c   : > { %p542_p8 = pnand %p541_p3, %p852_p1 }
  0x9d   : > { %p547_p6 = por %p546_p4, %p545_p2 }
  0x9e   : > { %p543_p0 = pneg %p542_p8 }
  0x9f   : > { %p549_p13 = por %p548_p12, %p547_p6 }
  0xa1   : > { %p550_p9 = pnand %p549_p13, %p543_p0 }
  0xa3   : > { %553 = shalt.err (!%p550_p9)
}
  0xa4   : > { %408 = dma.vmem_to_hbm [thread:$0]  (%p852_p1), %s793_s5, 16, %s798_s28, %s282_s26  }
  0xa5 PF: > { %p422_p5 = scmp.ge.s32.totalorder %s596_s12, 2  ;;  %s306_s23 = sand.u32 1, %s584_s9  }
  0xa6   : > { %p853_p7 = scmp.ne.s32.totalorder %s847_s22, 0  ;;  %s307_s27 = scalar_lea.sflag [#allocation4], %s306_s23 }
  0xa8   : > { %p418_p10 = pnand %p422_p5, %p853_p7 }
  0xaa   : > { %579 = dma.done.wait (!%p418_p10), %s307_s27, 16  }
  0xab   : > { %581 = vsyncadd (!%p418_p10), %s307_s27, 4294967280  ;;  %p18_p11 = scmp.ge.s32.totalorder %s644_s15, 6   ;;  %s854_s9 = smov %s588_s10 }
  0xac   : > { %s855_s10 = smov %s592_s11  ;;  %s856_s11 = smov %s656_s18 }
  0xad   : > { %s857_s12 = smov %s644_s15  ;;  %20 = sbr.rel (!%p18_p11) target bundleno = 7 (0x7), region = 88 }
  0xb4   :  { %311 = vsyncpa [#allocation3], 1 }
  0xb5   :  { %313 = vsyncpa [#allocation3 + $0x1], 1 }
  0xb6   :  { %314 = vsyncpa [#allocation6], 1 }
  0xb7   :  { %316 = vsyncpa [#allocation6 + $0x1], 1 }
  0xb8   :  { %317 = vsyncpa [#allocation4], 1 }
  0xb9   :  { %319 = vsyncpa [#allocation4 + $0x1], 1 }

</bundles_post_ra>
